<compile_context>
chip_gen: v7x
topology: tpu7x:2x2x1
jax: 0.10.0
libtpu: 0.0.40
codegen_flags: <defaults>
</compile_context>

<pallas_src>
import jax
import jax.numpy as jnp
from jax.experimental import pallas as pl
from jax.experimental.pallas import tpu as pltpu

D_IN = 180        # true feature / hidden width
D_PAD = 256       # padded hidden width (2 x 128 lanes)
D_OUT = 7         # true number of classes
D_OUT_PAD = 128   # padded output width (1 x 128 lanes -> unmasked stores)
MAX_TB = 2048     # max batch tile (~12 MB working set; fits v5e/v6e/v7x VMEM)


def mlp_kernel(x_ref, w1_ref, b1_ref, w2_ref, b2_ref, w3_ref, b3_ref, o_ref):
    # x_ref: (tb, 180) f32; weights bf16; biases f32 (1, N); o_ref: (tb, 128) bf16.
    x = x_ref[...].astype(jnp.bfloat16)                                # cast in-kernel
    h1 = jnp.dot(x, w1_ref[...], preferred_element_type=jnp.float32) + b1_ref[...]
    h1 = jnp.maximum(h1, 0.0).astype(jnp.bfloat16)                     # ReLU
    h2 = jnp.dot(h1, w2_ref[...], preferred_element_type=jnp.float32) + b2_ref[...]
    h2 = jnp.maximum(h2, 0.0).astype(jnp.bfloat16)                     # ReLU
    out = jnp.dot(h2, w3_ref[...], preferred_element_type=jnp.float32) + b3_ref[...]
    o_ref[...] = out.astype(jnp.bfloat16)                              # bf16 writeback


def prepare_params(params):
    """One-time prep: transpose to (in, out), zero-pad, cast weights to bf16.

    w1 keeps K = 180 rows (matches the unpadded activation feature dim).
    w2/w3 keep K = 256 rows because h1/h2 are padded to 256 hidden columns
    (padded columns are 0 + 0 bias, ReLU(0) = 0, so the math stays exact).
    """
    w1, b1, w2, b2, w3, b3 = params

    def pad_w(w_t, in_pad, out_pad):        # w_t is (in, out)
        return jnp.pad(
            w_t.astype(jnp.float32),
            ((0, in_pad - w_t.shape[0]), (0, out_pad - w_t.shape[1])),
        ).astype(jnp.bfloat16)

    def pad_b(b, out_pad):                  # -> (1, out_pad) f32
        return jnp.pad(b.astype(jnp.float32), (0, out_pad - b.shape[0])).reshape(1, -1)

    w1p = pad_w(w1.T, D_IN, D_PAD)          # (180, 256)
    w2p = pad_w(w2.T, D_PAD, D_PAD)         # (256, 256)
    w3p = pad_w(w3.T, D_PAD, D_OUT_PAD)     # (256, 128)
    b1p = pad_b(b1, D_PAD)
    b2p = pad_b(b2, D_PAD)
    b3p = pad_b(b3, D_OUT_PAD)
    return (w1p, b1p, w2p, b2p, w3p, b3p)


def _round_up(n, m):
    return ((n + m - 1) // m) * m


def _choose_tb(B):
    """Batch tile: multiple of 8, capped at MAX_TB, >=2 grid steps when possible
    (so both v7x TensorCores get work via the "parallel" batch axis)."""
    if B <= 8:
        return B                            # single block equal to the full batch dim
    b8 = _round_up(B, 8)
    if b8 <= MAX_TB:
        return _round_up(pl.cdiv(b8, 2), 8)
    return MAX_TB


@jax.jit
def mlp_forward(x, prepared_params):
    """x: (B, ...) -> logits (B, 7) f32. Uses pre-prepared (padded, bf16) params."""
    B = x.shape[0]
    x2d = x.reshape(B, -1)
    assert x2d.shape[1] == D_IN, f"expected {D_IN} features, got {x2d.shape[1]}"

    tb = _choose_tb(B)
    n_blocks = pl.cdiv(B, tb)
    b_out = n_blocks * tb                   # output array exactly tiled by tb

    w1p, b1p, w2p, b2p, w3p, b3p = prepared_params

    out_pad = pl.pallas_call(
        mlp_kernel,
        out_shape=jax.ShapeDtypeStruct((b_out, D_OUT_PAD), jnp.bfloat16),
        grid=(n_blocks,),
        in_specs=[
            pl.BlockSpec((tb, D_IN), lambda i: (i, 0)),            # x tile (pipelined)
            pl.BlockSpec((D_IN, D_PAD), lambda i: (0, 0)),         # w1 (resident)
            pl.BlockSpec((1, D_PAD), lambda i: (0, 0)),            # b1
            pl.BlockSpec((D_PAD, D_PAD), lambda i: (0, 0)),        # w2
            pl.BlockSpec((1, D_PAD), lambda i: (0, 0)),            # b2
            pl.BlockSpec((D_PAD, D_OUT_PAD), lambda i: (0, 0)),    # w3
            pl.BlockSpec((1, D_OUT_PAD), lambda i: (0, 0)),        # b3
        ],
        out_specs=pl.BlockSpec((tb, D_OUT_PAD), lambda i: (i, 0)),
        compiler_params=pltpu.CompilerParams(
            dimension_semantics=("parallel",),
            vmem_limit_bytes=32 * 1024 * 1024,
        ),
    )(x2d, w1p, b1p, w2p, b2p, w3p, b3p)

    return out_pad[:B, :D_OUT].astype(jnp.float32)


def init_params(key):
    """Deterministic init mirroring nn.Linear default (uniform +/- 1/sqrt(fan_in))."""
    def linear(key, fan_in, fan_out):
        kw, kb = jax.random.split(key)
        bound = 1.0 / jnp.sqrt(fan_in)
        w = jax.random.uniform(kw, (fan_out, fan_in), jnp.float32, -bound, bound)
        b = jax.random.uniform(kb, (fan_out,), jnp.float32, -bound, bound)
        return w, b

    k1, k2, k3 = jax.random.split(key, 3)
    w1, b1 = linear(k1, D_IN, D_IN)
    w2, b2 = linear(k2, D_IN, D_IN)
    w3, b3 = linear(k3, D_IN, D_OUT)
    return (w1, b1, w2, b2, w3, b3)


def reference_forward(x, params):
    """Pure-JAX f32 reference for correctness check."""
    B = x.shape[0]
    x2d = x.reshape(B, -1).astype(jnp.float32)
    w1, b1, w2, b2, w3, b3 = params
    h1 = jnp.maximum(x2d @ w1.T + b1, 0.0)
    h2 = jnp.maximum(h1 @ w2.T + b2, 0.0)
    return h2 @ w3.T + b3


if __name__ == "__main__":
    key = jax.random.PRNGKey(0)
    kx1, kx2, kp = jax.random.split(key, 3)

    params = init_params(kp)
    # One-time param prep (transpose / pad / bf16 cast hoisted out of the call path).
    prepared = jax.tree_util.tree_map(jax.block_until_ready, prepare_params(params))

    # Case 1: tiny batch (single full-dim block, grid=(1,)).
    x1 = jax.random.normal(kx1, (2, D_IN), jnp.float32)
    out1 = jax.block_until_ready(mlp_forward(x1, prepared))
    ref1 = reference_forward(x1, params)
    assert out1.shape == (2, D_OUT), out1.shape
    assert jnp.allclose(out1, ref1, atol=5e-2, rtol=2e-2), (
        "mismatch vs reference", float(jnp.max(jnp.abs(out1 - ref1))))

    # Case 2: non-flat input, batch not a multiple of the tile (partial-block path).
    x2 = jax.random.normal(kx2, (20, 4, 45), jnp.float32)
    out2 = jax.block_until_ready(mlp_forward(x2, prepared))
    ref2 = reference_forward(x2, params)
    assert out2.shape == (20, D_OUT), out2.shape
    assert jnp.allclose(out2, ref2, atol=5e-2, rtol=2e-2), (
        "mismatch vs reference", float(jnp.max(jnp.abs(out2 - ref2))))

    print("KERNEL_OK")
</pallas_src>

<mosaic_0001>
module attributes {stable_mosaic.version = 11 : i64} {
  func.func @mlp_kernel(%arg0: i32, %arg1: memref<2x180xf32, #tpu.memory_space<vmem>>, %arg2: memref<180x256xbf16, #tpu.memory_space<vmem>>, %arg3: memref<1x256xf32, #tpu.memory_space<vmem>>, %arg4: memref<256x256xbf16, #tpu.memory_space<vmem>>, %arg5: memref<1x256xf32, #tpu.memory_space<vmem>>, %arg6: memref<256x128xbf16, #tpu.memory_space<vmem>>, %arg7: memref<1x128xf32, #tpu.memory_space<vmem>>, %arg8: memref<2x128xbf16, #tpu.memory_space<vmem>>) attributes {dimension_semantics = [#tpu.dimension_semantics<parallel>], iteration_bounds = array<i64: 1>, scalar_prefetch = 0 : i64, scratch_operands = 0 : i64, tpu.core_type = #tpu.core_type<tc>, window_params = [{transform_indices = @transform_0, window_bounds = array<i64: 2, 180>}, {pipeline_mode = #tpu.pipeline_mode<synchronous>, transform_indices = @transform_1, window_bounds = array<i64: 180, 256>}, {pipeline_mode = #tpu.pipeline_mode<synchronous>, transform_indices = @transform_2, window_bounds = array<i64: 1, 256>}, {pipeline_mode = #tpu.pipeline_mode<synchronous>, transform_indices = @transform_3, window_bounds = array<i64: 256, 256>}, {pipeline_mode = #tpu.pipeline_mode<synchronous>, transform_indices = @transform_4, window_bounds = array<i64: 1, 256>}, {pipeline_mode = #tpu.pipeline_mode<synchronous>, transform_indices = @transform_5, window_bounds = array<i64: 256, 128>}, {pipeline_mode = #tpu.pipeline_mode<synchronous>, transform_indices = @transform_6, window_bounds = array<i64: 1, 128>}, {transform_indices = @transform_7, window_bounds = array<i64: 2, 128>}]} {
    %c0 = arith.constant 0 : index
    %c0_0 = arith.constant 0 : index
    %0 = vector.load %arg1[%c0, %c0_0] : memref<2x180xf32, #tpu.memory_space<vmem>>, vector<2x180xf32>
    %1 = arith.truncf %0 : vector<2x180xf32> to vector<2x180xbf16>
    %c0_1 = arith.constant 0 : index
    %c0_2 = arith.constant 0 : index
    %2 = vector.load %arg2[%c0_1, %c0_2] : memref<180x256xbf16, #tpu.memory_space<vmem>>, vector<180x256xbf16>
    %cst = arith.constant dense<0.000000e+00> : vector<2x256xf32>
    %3 = tpu.matmul %1, %2, %cst {dimension_numbers = #tpu.dot_dimension_numbers<[1], [0], [0], [1], [0, 0, 1, 1], [], []>} : vector<2x180xbf16>, vector<180x256xbf16>, vector<2x256xf32> -> vector<2x256xf32>
    %c0_3 = arith.constant 0 : index
    %c0_4 = arith.constant 0 : index
    %4 = vector.load %arg3[%c0_3, %c0_4] : memref<1x256xf32, #tpu.memory_space<vmem>>, vector<1x256xf32>
    %5 = vector.broadcast %4 : vector<1x256xf32> to vector<2x256xf32>
    %6 = arith.addf %3, %5 : vector<2x256xf32>
    %cst_5 = arith.constant 0.000000e+00 : f32
    %7 = vector.broadcast %cst_5 : f32 to vector<2x256xf32>
    %8 = arith.maximumf %6, %7 : vector<2x256xf32>
    %9 = arith.truncf %8 : vector<2x256xf32> to vector<2x256xbf16>
    %c0_6 = arith.constant 0 : index
    %c0_7 = arith.constant 0 : index
    %10 = vector.load %arg4[%c0_6, %c0_7] : memref<256x256xbf16, #tpu.memory_space<vmem>>, vector<256x256xbf16>
    %cst_8 = arith.constant dense<0.000000e+00> : vector<2x256xf32>
    %11 = tpu.matmul %9, %10, %cst_8 {dimension_numbers = #tpu.dot_dimension_numbers<[1], [0], [0], [1], [0, 0, 1, 1], [], []>} : vector<2x256xbf16>, vector<256x256xbf16>, vector<2x256xf32> -> vector<2x256xf32>
    %c0_9 = arith.constant 0 : index
    %c0_10 = arith.constant 0 : index
    %12 = vector.load %arg5[%c0_9, %c0_10] : memref<1x256xf32, #tpu.memory_space<vmem>>, vector<1x256xf32>
    %13 = vector.broadcast %12 : vector<1x256xf32> to vector<2x256xf32>
    %14 = arith.addf %11, %13 : vector<2x256xf32>
    %cst_11 = arith.constant 0.000000e+00 : f32
    %15 = vector.broadcast %cst_11 : f32 to vector<2x256xf32>
    %16 = arith.maximumf %14, %15 : vector<2x256xf32>
    %17 = arith.truncf %16 : vector<2x256xf32> to vector<2x256xbf16>
    %c0_12 = arith.constant 0 : index
    %c0_13 = arith.constant 0 : index
    %18 = vector.load %arg6[%c0_12, %c0_13] : memref<256x128xbf16, #tpu.memory_space<vmem>>, vector<256x128xbf16>
    %cst_14 = arith.constant dense<0.000000e+00> : vector<2x128xf32>
    %19 = tpu.matmul %17, %18, %cst_14 {dimension_numbers = #tpu.dot_dimension_numbers<[1], [0], [0], [1], [0, 0, 1, 1], [], []>} : vector<2x256xbf16>, vector<256x128xbf16>, vector<2x128xf32> -> vector<2x128xf32>
    %c0_15 = arith.constant 0 : index
    %c0_16 = arith.constant 0 : index
    %20 = vector.load %arg7[%c0_15, %c0_16] : memref<1x128xf32, #tpu.memory_space<vmem>>, vector<1x128xf32>
    %21 = vector.broadcast %20 : vector<1x128xf32> to vector<2x128xf32>
    %22 = arith.addf %19, %21 : vector<2x128xf32>
    %23 = arith.truncf %22 : vector<2x128xf32> to vector<2x128xbf16>
    %c0_17 = arith.constant 0 : index
    %c0_18 = arith.constant 0 : index
    %24 = vector.load %arg8[%c0_17, %c0_18] : memref<2x128xbf16, #tpu.memory_space<vmem>>, vector<2x128xbf16>
    tpu.vector_store %arg8[%c0_17, %c0_18], %23 {strides = array<i32>} : memref<2x128xbf16, #tpu.memory_space<vmem>>, vector<2x128xbf16>,
    return
  }
  func.func @transform_0(%arg0: i32) -> (i32, i32) {
    %c0_i32 = arith.constant 0 : i32
    %c0_i32_0 = arith.constant 0 : i32
    return %arg0, %c0_i32 : i32, i32
  }
  func.func @transform_1(%arg0: i32) -> (i32, i32) {
    %c0_i32 = arith.constant 0 : i32
    %c0_i32_0 = arith.constant 0 : i32
    %c0_i32_1 = arith.constant 0 : i32
    return %c0_i32, %c0_i32_0 : i32, i32
  }
  func.func @transform_2(%arg0: i32) -> (i32, i32) {
    %c0_i32 = arith.constant 0 : i32
    %c0_i32_0 = arith.constant 0 : i32
    %c0_i32_1 = arith.constant 0 : i32
    return %c0_i32, %c0_i32_0 : i32, i32
  }
  func.func @transform_3(%arg0: i32) -> (i32, i32) {
    %c0_i32 = arith.constant 0 : i32
    %c0_i32_0 = arith.constant 0 : i32
    %c0_i32_1 = arith.constant 0 : i32
    return %c0_i32, %c0_i32_0 : i32, i32
  }
  func.func @transform_4(%arg0: i32) -> (i32, i32) {
    %c0_i32 = arith.constant 0 : i32
    %c0_i32_0 = arith.constant 0 : i32
    %c0_i32_1 = arith.constant 0 : i32
    return %c0_i32, %c0_i32_0 : i32, i32
  }
  func.func @transform_5(%arg0: i32) -> (i32, i32) {
    %c0_i32 = arith.constant 0 : i32
    %c0_i32_0 = arith.constant 0 : i32
    %c0_i32_1 = arith.constant 0 : i32
    return %c0_i32, %c0_i32_0 : i32, i32
  }
  func.func @transform_6(%arg0: i32) -> (i32, i32) {
    %c0_i32 = arith.constant 0 : i32
    %c0_i32_0 = arith.constant 0 : i32
    %c0_i32_1 = arith.constant 0 : i32
    return %c0_i32, %c0_i32_0 : i32, i32
  }
  func.func @transform_7(%arg0: i32) -> (i32, i32) {
    %c0_i32 = arith.constant 0 : i32
    %c0_i32_0 = arith.constant 0 : i32
    return %arg0, %c0_i32 : i32, i32
  }
}

</mosaic_0001>

<bundles_post_ra>
// kernel: mlp_forward.1
= control target key start
LH: loop header
LB: loop body
LE: loop exit
PB: predicated region body
PF: predicated region fallthrough
CT: control target
= control target key end

     0   :  { %12 = vsyncpa [#allocation3], 0  ;;  %s1154_s0 = inlined_call_operand.hbm [shape: f32[2,180], index: 0, kind: input, shape index: {}]   ;;  %s1155_s1 = inlined_call_operand.hbm [shape: bf16[180,256], index: 1, kind: input, shape index: {}]   ;;  %s1156_s2 = inlined_call_operand.vmem [shape: f32[1,256], index: 2, kind: input, shape index: {}]   ;;  %s1157_s3 = inlined_call_operand.hbm [shape: bf16[256,256], index: 3, kind: input, shape index: {}]   ;;  %s1158_s4 = inlined_call_operand.vmem [shape: f32[1,256], index: 4, kind: input, shape index: {}]   ;;  %s1159_s5 = inlined_call_operand.hbm [shape: bf16[256,128], index: 5, kind: input, shape index: {}]   ;;  %s1160_s6 = inlined_call_operand.vmem [shape: f32[1,128], index: 6, kind: input, shape index: {}]   ;;  %s1161_s7 = inlined_call_operand.vmem [shape: bf16[2,128], index: 7, kind: output, shape index: {}]  }
   0x1   :  { %13 = vsyncpa [#allocation5], 0 }
   0x2   :  { %14 = vsyncpa [#allocation8], 0  ;;  %s1032_s24 = smov [#allocation4]   ;;  %s938_s28 = scalar_lea.hbm %s1155_s1, 2944 }
   0x3   :  { %s30_s25 = sshll.u32 %s1032_s24, 4  ;;  %p939_p0 = scmp.ne.s32.totalorder %s1155_s1, %s938_s28  ;;  %s31_s25 = int_to_ptr.vmem [resolvable:$true] %s30_s25 }
   0x4   :  { %p942_p1 = scmp.lt.u32.totalorder %s938_s28, %s1155_s1 }
   0x6   :  { %p944_p2 = pnand %p942_p1, %p939_p0 }
   0x8   :  { %947 = shalt.err (!%p944_p2)
}
   0x9   :  { %s948_s10 = scalar_lea.vmem %s31_s25, 2944  ;;  %p953_p4 = scmp.lt.s32.totalorder %s31_s25, %s31_s25 }
   0xa   :  { %p949_p3 = scmp.ne.s32.totalorder %s31_s25, %s948_s10  ;;  %p954_p5 = scmp.lt.s32.totalorder %s948_s10, %s948_s10 }
   0xc   :  { %p955_p6 = por %p954_p5, %p953_p4 }
   0xe   :  { %p956_p7 = pnand %p955_p6, %p949_p3 }
  0x10   :  { %959 = shalt.err (!%p956_p7)
}
  0x11   :  { %s1033_s11 = smov 128   ;;  %s1034_s12 = smov 8  }
  0x12   :  { %36 = dma.hbm_to_vmem [thread:$0]  %s1155_s1, 2944, %s31_s25, [#allocation5], %s1033_s11, %s1033_s11, %s1034_s12  }
  0x13   :  { %s1035_s15 = smov [#allocation2]   ;;  %s1036_s17 = smov [#allocation6]  }
  0x14   :  { %s21_s16 = sshll.u32 %s1035_s15, 4  ;;  %s44_s18 = sshll.u32 %s1036_s17, 4  ;;  %s22_s16 = int_to_ptr.vmem [resolvable:$true] %s21_s16  ;;  %s45_s18 = int_to_ptr.vmem [resolvable:$true] %s44_s18 }
  0x15   :  { %s960_s21 = scalar_lea.hbm %s1154_s0, 64 }
  0x16   :  { %p961_p8 = scmp.ne.s32.totalorder %s1154_s0, %s960_s21  ;;  %p964_p9 = scmp.lt.u32.totalorder %s960_s21, %s1154_s0 }
  0x18   :  { %p966_p10 = pnand %p964_p9, %p961_p8 }
  0x1a   :  { %969 = shalt.err (!%p966_p10)
}
  0x1b   :  { %s970_s1 = scalar_lea.vmem %s22_s16, 64  ;;  %p975_p12 = scmp.lt.s32.totalorder %s22_s16, %s22_s16 }
  0x1c   :  { %p971_p11 = scmp.ne.s32.totalorder %s22_s16, %s970_s1  ;;  %p976_p13 = scmp.lt.s32.totalorder %s970_s1, %s970_s1 }
  0x1e   :  { %p977_p0 = por %p976_p13, %p975_p12 }
  0x20   :  { %p978_p1 = pnand %p977_p0, %p971_p11 }
  0x22   :  { %981 = shalt.err (!%p978_p1)
}
  0x23   :  { %24 = dma.hbm_to_vmem [thread:$0]  %s1154_s0, 64, %s22_s16, [#allocation3]  }
  0x24   :  { %s982_s30 = scalar_lea.hbm %s1157_s3, 4096 }
  0x25   :  { %p983_p2 = scmp.ne.s32.totalorder %s1157_s3, %s982_s30  ;;  %p986_p3 = scmp.lt.u32.totalorder %s982_s30, %s1157_s3 }
  0x27   :  { %p988_p4 = pnand %p986_p3, %p983_p2 }
  0x29   :  { %991 = shalt.err (!%p988_p4)
}
  0x2a   :  { %s992_s14 = scalar_lea.vmem %s45_s18, 4096  ;;  %p997_p6 = scmp.lt.s32.totalorder %s45_s18, %s45_s18 }
  0x2b   :  { %p993_p5 = scmp.ne.s32.totalorder %s45_s18, %s992_s14  ;;  %p998_p7 = scmp.lt.s32.totalorder %s992_s14, %s992_s14 }
  0x2d   :  { %p999_p8 = por %p998_p7, %p997_p6 }
  0x2f   :  { %p1000_p9 = pnand %p999_p8, %p993_p5 }
  0x31   :  { %1003 = shalt.err (!%p1000_p9)
}
  0x32   :  { %50 = dma.hbm_to_vmem [thread:$0]  %s1157_s3, 4096, %s45_s18, [#allocation5], %s1033_s11, %s1033_s11, %s1034_s12  }
  0x33   :  { %s1037_s16 = smov [#allocation7]   ;;  %s1004_s21 = scalar_lea.hbm %s1159_s5, 2048 }
  0x34   :  { %s58_s17 = sshll.u32 %s1037_s16, 4  ;;  %p1005_p10 = scmp.ne.s32.totalorder %s1159_s5, %s1004_s21  ;;  %s59_s17 = int_to_ptr.vmem [resolvable:$true] %s58_s17 }
  0x35   :  { %p1008_p11 = scmp.lt.u32.totalorder %s1004_s21, %s1159_s5 }
  0x37   :  { %p1010_p12 = pnand %p1008_p11, %p1005_p10 }
  0x39   :  { %1013 = shalt.err (!%p1010_p12)
}
  0x3a   :  { %s1014_s1 = scalar_lea.vmem %s59_s17, 2048  ;;  %p1019_p0 = scmp.lt.s32.totalorder %s59_s17, %s59_s17 }
  0x3b   :  { %p1015_p13 = scmp.ne.s32.totalorder %s59_s17, %s1014_s1  ;;  %p1020_p1 = scmp.lt.s32.totalorder %s1014_s1, %s1014_s1 }
  0x3d   :  { %p1021_p2 = por %p1020_p1, %p1019_p0 }
  0x3f   :  { %p1022_p3 = pnand %p1021_p2, %p1015_p13 }
  0x41   :  { %1025 = shalt.err (!%p1022_p3)
}
  0x42   :  { %s1038_s3 = smov 64   ;;  %s1039_s11 = smov 4  }
  0x43   :  { %64 = dma.hbm_to_vmem [thread:$0]  %s1159_s5, 2048, %s59_s17, [#allocation8], %s1038_s3, %s1038_s3, %s1039_s11  }
  0x44   :  { %1026 = dma.done.wait [#allocation3], 64  }
  0x45   :  { %1027 = vsyncadd [#allocation3], 4294967232 }
  0x46   :  { %1028 = dma.done.wait [#allocation5], 7040  }
  0x47   :  { %1029 = vsyncadd [#allocation5], 4294960256 }
  0x48   :  { %1030 = dma.done.wait [#allocation8], 2048  }
  0x49   :  { %1031 = vsyncadd [#allocation8], 4294965248  ;;  %v839_v0 = vld [vmem:[#allocation4 + $0x4] ss:$8 sps:$4 sm:$0xff]   ;;  %v841_v1 = vld [vmem:[#allocation4] ss:$8 sps:$4 sm:$0xff]  }
  0x4a   :  { %255 = vmatprep.subr.bf16.mxu0 %v839_v0  ;;  %v842_v2 = vld [vmem:[#allocation4 + $0x14] ss:$8 sps:$4 sm:$0xff]   ;;  %v844_v3 = vld [vmem:[#allocation4 + $0x10] ss:$8 sps:$4 sm:$0xff]   ;;  %v845_v4 = vld [vmem:[#allocation4 + $0x24] ss:$8 sps:$4 sm:$0xff]  }
  0x4b   :  { %256 = vmatpush1.bf16.msra.mxu0 %v841_v1  ;;  %v847_v5 = vld [vmem:[#allocation4 + $0x20] ss:$8 sps:$4 sm:$0xff]   ;;  %v848_v6 = vld [vmem:[#allocation4 + $0x34] ss:$8 sps:$4 sm:$0xff]   ;;  %v850_v7 = vld [vmem:[#allocation4 + $0x30] ss:$8 sps:$4 sm:$0xff]  }
  0x4c   :  { %257 = vmatprep.subr.bf16.mxu0 %v842_v2  ;;  %v851_v8 = vld [vmem:[#allocation4 + $0x44] ss:$8 sps:$4 sm:$0xff]   ;;  %v853_v9 = vld [vmem:[#allocation4 + $0x40] ss:$8 sps:$4 sm:$0xff]   ;;  %v854_v10 = vld [vmem:[#allocation4 + $0x54] ss:$8 sps:$4 sm:$0xff]  }
  0x4d   :  { %v1134_v11 = vld.sshfl [vmem:[#allocation2] sm:$0x33 pattern:$0x76325410]  ;;  %v876_v14 = vld [vmem:[#allocation6] ss:$8 sps:$4 sm:$0xff]  }
  0x4e   :  { %v89_v12 = vcombine.high %v1134_v11, %v1134_v11  ;;  %v874_v13 = vld [vmem:[#allocation6 + $0x4] ss:$8 sps:$4 sm:$0xff]   ;;  %vm244_vm0 = vcmask 424960   ;;  %v877_v15 = vld [vmem:[#allocation6 + $0x14] ss:$8 sps:$4 sm:$0xff]   ;;  %vm248_vm1 = vcmask 1041408   ;;  %v92_v46 = vpack.c.bf16 %v1134_v11, %v1134_v11 }
  0x4f   :  { %258 = vmatpush1.bf16.msra.mxu0 %v844_v3  ;;  %v856_v16 = vld [vmem:[#allocation4 + $0x50] ss:$8 sps:$4 sm:$0xff]   ;;  %504 = vmatprep.subr.bf16.mxu1 %v874_v13  ;;  %v857_v19 = vld [vmem:[#allocation4 + $0x64] ss:$8 sps:$4 sm:$0xff]   ;;  %v859_v21 = vld [vmem:[#allocation4 + $0x60] ss:$8 sps:$4 sm:$0xff]  }
  0x50   :  { %259 = vmatprep.subr.bf16.mxu0 %v845_v4  ;;  %v93_v17 = vpack.c.bf16 %v89_v12, %v89_v12  ;;  %505 = vmatpush1.bf16.msra.mxu1 %v876_v14  ;;  %v879_v18 = vld [vmem:[#allocation6 + $0x10] ss:$8 sps:$4 sm:$0xff]   ;;  %v880_v20 = vld [vmem:[#allocation6 + $0x24] ss:$8 sps:$4 sm:$0xff]   ;;  %v882_v22 = vld [vmem:[#allocation6 + $0x20] ss:$8 sps:$4 sm:$0xff]  }
  0x51   :  { %506 = vmatprep.subr.bf16.mxu1 %v877_v15  ;;  %v860_v23 = vld [vmem:[#allocation4 + $0x74] ss:$8 sps:$4 sm:$0xff]   ;;  %v862_v25 = vld [vmem:[#allocation4 + $0x70] ss:$8 sps:$4 sm:$0xff]   ;;  %v863_v26 = vld [vmem:[#allocation4 + $0x84] ss:$8 sps:$4 sm:$0xff]  }
  0x52   :  { %759 = vmatprep.mubr.msk.bf16.mxu0 %vm244_vm0, %v93_v17  ;;  %v883_v24 = vld [vmem:[#allocation6 + $0x34] ss:$8 sps:$4 sm:$0xff]   ;;  %v885_v27 = vld [vmem:[#allocation6 + $0x30] ss:$8 sps:$4 sm:$0xff]   ;;  %v886_v29 = vld [vmem:[#allocation6 + $0x44] ss:$8 sps:$4 sm:$0xff]  }
  0x53   :  { %260 = vmatpush1.bf16.msra.mxu0 %v847_v5  ;;  %v116_v28 = vld [vmem:[#allocation4 + $0xb0] sm:$0x33]  ;;  %v865_v30 = vld [vmem:[#allocation4 + $0x80] ss:$8 sps:$4 sm:$0xff]   ;;  %v869_v37 = vld [vmem:[#allocation4 + $0xa4] ss:$8 sps:$4 sm:$0xff]  }
  0x54   :  { %261 = vmatprep.subr.bf16.mxu0 %v848_v6  ;;  %507 = vmatpush1.bf16.msra.mxu1 %v879_v18  ;;  %v756_v31 = vcombine.low %v116_v28, %v116_v28  ;;  %v888_v32 = vld [vmem:[#allocation6 + $0x40] ss:$8 sps:$4 sm:$0xff]   ;;  %v866_v33 = vld [vmem:[#allocation4 + $0x94] ss:$8 sps:$4 sm:$0xff]   ;;  %v891_v36 = vld [vmem:[#allocation6 + $0x50] ss:$8 sps:$4 sm:$0xff]   ;;  %v757_v43 = vcombine.high %v116_v28, %v116_v28 }
  0x55   :  { %508 = vmatprep.subr.bf16.mxu1 %v880_v20  ;;  %v889_v34 = vld [vmem:[#allocation6 + $0x54] ss:$8 sps:$4 sm:$0xff]   ;;  %v868_v35 = vld [vmem:[#allocation4 + $0x90] ss:$8 sps:$4 sm:$0xff]   ;;  %v892_v38 = vld [vmem:[#allocation6 + $0x64] ss:$8 sps:$4 sm:$0xff]  }
  0x56   :  { %v250_v39 = vsel %vm248_vm1, %v756_v31, 0  ;;  %v871_v40 = vld [vmem:[#allocation4 + $0xa0] ss:$8 sps:$4 sm:$0xff]   ;;  %v895_v42 = vld [vmem:[#allocation6 + $0x74] ss:$8 sps:$4 sm:$0xff]   ;;  %v922_v62 = vld [vmem:[#allocation7 + $0x40] sm:$0xff]  }
  0x57   :  { %262 = vmatpush1.bf16.msra.mxu0 %v850_v7  ;;  %v894_v41 = vld [vmem:[#allocation6 + $0x60] ss:$8 sps:$4 sm:$0xff]   ;;  %v897_v44 = vld [vmem:[#allocation6 + $0x70] ss:$8 sps:$4 sm:$0xff]   ;;  %v898_v45 = vld [vmem:[#allocation6 + $0x84] ss:$8 sps:$4 sm:$0xff]  }
  0x58   :  { %263 = vmatprep.subr.bf16.mxu0 %v851_v8  ;;  %509 = vmatpush1.bf16.msra.mxu1 %v882_v22  ;;  %v900_v47 = vld [vmem:[#allocation6 + $0x80] ss:$8 sps:$4 sm:$0xff]   ;;  %v901_v48 = vld [vmem:[#allocation6 + $0x94] ss:$8 sps:$4 sm:$0xff]   ;;  %v903_v49 = vld [vmem:[#allocation6 + $0x90] ss:$8 sps:$4 sm:$0xff]  }
  0x59   :  { %510 = vmatprep.subr.bf16.mxu1 %v883_v24  ;;  %v904_v50 = vld [vmem:[#allocation6 + $0xa4] ss:$8 sps:$4 sm:$0xff]   ;;  %v906_v51 = vld [vmem:[#allocation6 + $0xa0] ss:$8 sps:$4 sm:$0xff]   ;;  %v907_v52 = vld [vmem:[#allocation6 + $0xb4] ss:$8 sps:$4 sm:$0xff]  }
  0x5a   :  { %v909_v53 = vld [vmem:[#allocation6 + $0xb0] ss:$8 sps:$4 sm:$0xff]   ;;  %v910_v54 = vld [vmem:[#allocation6 + $0xc4] ss:$8 sps:$4 sm:$0xff]   ;;  %v912_v55 = vld [vmem:[#allocation6 + $0xc0] ss:$8 sps:$4 sm:$0xff]  }
  0x5b   :  { %264 = vmatpush1.bf16.msra.mxu0 %v853_v9  ;;  %v913_v56 = vld [vmem:[#allocation6 + $0xd4] ss:$8 sps:$4 sm:$0xff]   ;;  %v915_v57 = vld [vmem:[#allocation6 + $0xd0] ss:$8 sps:$4 sm:$0xff]   ;;  %v916_v58 = vld [vmem:[#allocation6 + $0xe4] ss:$8 sps:$4 sm:$0xff]  }
  0x5c   :  { %265 = vmatprep.subr.bf16.mxu0 %v854_v10  ;;  %511 = vmatpush1.bf16.msra.mxu1 %v885_v27  ;;  %v918_v59 = vld [vmem:[#allocation6 + $0xe0] ss:$8 sps:$4 sm:$0xff]   ;;  %v919_v60 = vld [vmem:[#allocation6 + $0xf4] ss:$8 sps:$4 sm:$0xff]   ;;  %v921_v61 = vld [vmem:[#allocation6 + $0xf0] ss:$8 sps:$4 sm:$0xff]   ;;  %v119_v10 = vlaneseq }
  0x5d   :  { %512 = vmatprep.subr.bf16.mxu1 %v886_v29  ;;  %v923_v63 = vld [vmem:[#allocation7] sm:$0xff]   ;;  %v924_v0 = vld [vmem:[#allocation7 + $0x48] sm:$0xff]   ;;  %v926_v2 = vld [vmem:[#allocation7 + $0x50] sm:$0xff]  }
  0x5e   :  { %v925_v1 = vld [vmem:[#allocation7 + $0x8] sm:$0xff]   ;;  %v927_v3 = vld [vmem:[#allocation7 + $0x10] sm:$0xff]   ;;  %v928_v4 = vld [vmem:[#allocation7 + $0x58] sm:$0xff]   ;;  %v120_v11 = vshrl.u32 %v119_v10, 7 }
  0x5f   :  { %266 = vmatpush1.bf16.msra.mxu0 %v856_v16  ;;  %v929_v5 = vld [vmem:[#allocation7 + $0x18] sm:$0xff]   ;;  %v930_v6 = vld [vmem:[#allocation7 + $0x60] sm:$0xff]   ;;  %v932_v8 = vld [vmem:[#allocation7 + $0x68] sm:$0xff]  }
  0x60   :  { %267 = vmatprep.subr.bf16.mxu0 %v857_v19  ;;  %513 = vmatpush1.bf16.msra.mxu1 %v888_v32  ;;  %v931_v7 = vld [vmem:[#allocation7 + $0x20] sm:$0xff]   ;;  %v933_v9 = vld [vmem:[#allocation7 + $0x28] sm:$0xff]   ;;  %v121_v12 = vsub.s32 0, %v120_v11  ;;  %v125_v14 = vsub.s32 1, %v120_v11  ;;  %v934_v27 = vld [vmem:[#allocation7 + $0x70] sm:$0xff]  }
  0x61   :  { %514 = vmatprep.subr.bf16.mxu1 %v889_v34  ;;  %v117_v13 = vld [vmem:[%s1156_s2] sm:$0x3]  ;;  %v935_v28 = vld [vmem:[#allocation7 + $0x30] sm:$0xff]   ;;  %v936_v29 = vld [vmem:[#allocation7 + $0x78] sm:$0xff]  }
  0x62   :  { %v122_v15 = vrot.slane %v117_v13, %v121_v12  ;;  %v126_v16 = vrot.slane %v117_v13, %v125_v14  ;;  %v332_v31 = vld [vmem:[%s1158_s4] sm:$0x3] }
  0x63   :  { %268 = vmatpush1.bf16.msra.mxu0 %v859_v21  ;;  %v337_v32 = vrot.slane %v332_v31, %v121_v12 }
  0x64   :  { %269 = vmatprep.subr.bf16.mxu0 %v860_v23  ;;  %515 = vmatpush1.bf16.msra.mxu1 %v891_v36 }
  0x65   :  { %516 = vmatprep.subr.bf16.mxu1 %v892_v38 }
  0x67   :  { %270 = vmatpush1.bf16.msra.mxu0 %v862_v25 }
  0x68   :  { %271 = vmatprep.subr.bf16.mxu0 %v863_v26  ;;  %517 = vmatpush1.bf16.msra.mxu1 %v894_v41 }
  0x69   :  { %518 = vmatprep.subr.bf16.mxu1 %v895_v42 }
  0x6b   :  { %272 = vmatpush1.bf16.msra.mxu0 %v865_v30  ;;  %v937_v30 = vld [vmem:[#allocation7 + $0x38] sm:$0xff]  }
  0x6c   :  { %273 = vmatprep.subr.bf16.mxu0 %v866_v33  ;;  %519 = vmatpush1.bf16.msra.mxu1 %v897_v44  ;;  %v341_v33 = vrot.slane %v332_v31, %v125_v14 }
  0x6d   :  { %520 = vmatprep.subr.bf16.mxu1 %v898_v45  ;;  %v792_v45 = vld [vmem:[%s1160_s6] ss:$0 sm:$0xff] }
  0x6f   :  { %274 = vmatpush1.bf16.msra.mxu0 %v868_v35 }
  0x70   :  { %275 = vmatprep.subr.bf16.mxu0 %v869_v37  ;;  %521 = vmatpush1.bf16.msra.mxu1 %v900_v47 }
  0x71   :  { %522 = vmatprep.subr.bf16.mxu1 %v901_v48 }
  0x73   :  { %276 = vmatpush1.bf16.msra.mxu0 %v871_v40 }
  0x74   :  { %758 = vmatprep.subr.msk.bf16.mxu0 %vm248_vm1, %v757_v43  ;;  %523 = vmatpush1.bf16.msra.mxu1 %v903_v49 }
  0x75   :  { %524 = vmatprep.subr.bf16.mxu1 %v904_v50 }
  0x77   :  { %278 = vmatpush1.bf16.msra.mxu0 %v250_v39 }
  0x78   :  { %525 = vmatpush1.bf16.msra.mxu1 %v906_v51  ;;  %809 = vmatprep.subr.bf16.mxu0 %v922_v62 }
  0x79   :  { %526 = vmatprep.subr.bf16.mxu1 %v907_v52 }
  0x7a   :  { %288 = vmatmul.mubr.bf16.vlgmr.msra.gmra.mrb[0].mxu0 %v92_v46 }
  0x7b   :  { %810 = vmatpush3.bf16.msra.mxu0 %v923_v63 }
  0x7c   :  { %527 = vmatpush1.bf16.msra.mxu1 %v909_v53  ;;  %811 = vmatprep.subr.bf16.mxu0 %v924_v0 }
  0x7d   :  { %528 = vmatprep.subr.bf16.mxu1 %v910_v54 }
  0x7f   :  { %812 = vmatpush3.bf16.msra.mxu0 %v925_v1 }
  0x80   :  { %529 = vmatpush1.bf16.msra.mxu1 %v912_v55  ;;  %813 = vmatprep.subr.bf16.mxu0 %v926_v2 }
  0x81   :  { %530 = vmatprep.subr.bf16.mxu1 %v913_v56 }
  0x83   :  { %814 = vmatpush3.bf16.msra.mxu0 %v927_v3 }
  0x84   :  { %531 = vmatpush1.bf16.msra.mxu1 %v915_v57  ;;  %815 = vmatprep.subr.bf16.mxu0 %v928_v4 }
  0x85   :  { %532 = vmatprep.subr.bf16.mxu1 %v916_v58 }
  0x87   :  { %816 = vmatpush3.bf16.msra.mxu0 %v929_v5 }
  0x88   :  { %533 = vmatpush1.bf16.msra.mxu1 %v918_v59  ;;  %817 = vmatprep.subr.bf16.mxu0 %v930_v6 }
  0x89   :  { %534 = vmatprep.subr.bf16.mxu1 %v919_v60 }
  0x8b   :  { %818 = vmatpush3.bf16.msra.mxu0 %v931_v7 }
  0x8c   :  { %535 = vmatpush1.bf16.msra.mxu1 %v921_v61  ;;  %819 = vmatprep.subr.bf16.mxu0 %v932_v8 }
  0x8f   :  { %820 = vmatpush3.bf16.msra.mxu0 %v933_v9 }
  0x90   :  { %821 = vmatprep.subr.bf16.mxu0 %v934_v27 }
  0x93   :  { %822 = vmatpush3.bf16.msra.mxu0 %v935_v28 }
  0x94   :  { %823 = vmatprep.subr.bf16.mxu0 %v936_v29 }
  0x97   :  { %824 = vmatpush3.bf16.msra.mxu0 %v937_v30 }
 0x14d   :  { %v289_v17 = vpop.f32.mrb[0].mxu0 }
 0x14e   :  { %v290_v18 = vadd.f32 %v289_v17, %v122_v15  ;;  %v291_v19 = vpop.f32.mrb[1].mxu0 }
 0x14f   :  { %v292_v20 = vadd.f32 %v291_v19, %v126_v16  ;;  %v293_v21 = vpop.f32.mrb[2].mxu0 }
 0x150   :  { %v296_v22 = vmax.f32 %v290_v18, 0.0  ;;  %v294_v23 = vpop.f32.mrb[3].mxu0 }
 0x151   :  { %v297_v24 = vmax.f32 %v292_v20, 0.0 }
 0x152   :  { %v298_v26 = vpack.c.bf16 %v296_v22, %v296_v22 }
 0x153   :  { %v299_v25 = vpack.c.bf16 %v297_v24, %v297_v24 }
 0x155   :  { %536 = vmatprep.mubr.bf16.mxu1 %v299_v25 }
 0x156   :  { %537 = vmatmul.mubr.bf16.vlgmr.msra.gmra.mrb[0].mxu1 %v298_v26 }
 0x229   :  { %v538_v34 = vpop.f32.mrb[0].mxu1 }
 0x22a   :  { %v539_v35 = vadd.f32 %v538_v34, %v337_v32  ;;  %v540_v36 = vpop.f32.mrb[1].mxu1 }
 0x22b   :  { %v541_v37 = vadd.f32 %v540_v36, %v341_v33  ;;  %v542_v38 = vpop.f32.mrb[2].mxu1 }
 0x22c   :  { %v545_v39 = vmax.f32 %v539_v35, 0.0  ;;  %v543_v40 = vpop.f32.mrb[3].mxu1 }
 0x22d   :  { %v546_v41 = vmax.f32 %v541_v37, 0.0 }
 0x22e   :  { %v547_v43 = vpack.c.bf16 %v545_v39, %v545_v39 }
 0x22f   :  { %v548_v42 = vpack.c.bf16 %v546_v41, %v546_v41 }
 0x231   :  { %716 = vmatprep.mubr.bf16.mxu0 %v548_v42 }
 0x232   :  { %717 = vmatmul.mubr.bf16.vlgmr.msra.gmra.mrb[4].mxu0 %v547_v43 }
 0x305   :  { %v825_v44 = vpop.f32.mrb[4].mxu0 }
 0x306   :  { %v826_v46 = vpop.f32.mrb[5].mxu0 }
 0x307   :  { %v827_v47 = vadd.f32 %v826_v46, %v825_v44  ;;  %v828_v48 = vpop.f32.mrb[6].mxu0 }
 0x308   :  { %v829_v49 = vpop.f32.mrb[7].mxu0 }
 0x309   :  { %v719_v50 = vadd.f32 %v827_v47, %v792_v45 }
 0x30b   :  { %v724_v51 = vpack.c.bf16 %v719_v50, %v719_v50 }
 0x30d   :  { %725 = vst [vmem:[%s1161_s7] sm:$0x1] %v724_v51 }
 0x30e   :  { %730 = vsyncpa [#allocation3], 1 }
 0x30f   :  { %731 = vsyncpa [#allocation5], 1 }
 0x310   :  { %732 = vsyncpa [#allocation8], 1 }

</bundles_post_ra>
